<compile_context>
chip_gen: v7x
topology: tpu7x:2x2x1
jax: 0.10.0
libtpu: 0.0.40
codegen_flags: <defaults>
</compile_context>

<pallas_src>
import jax
import jax.numpy as jnp
from jax.experimental import pallas as pl
from jax.experimental.pallas import tpu as pltpu


def style_merge_kernel(alpha_ref, style_ref, cfc_ref, w_ref, bias_ref, out_ref):
    # style_ref: (2, B, C), cfc_ref: (2, 1, C)
    # z = sum over the size-2 statistics axis of (style * cfc)  -> (B, C)
    z = style_ref[0] * cfc_ref[0] + style_ref[1] * cfc_ref[1]

    # PReLU with a single shared parameter alpha (read from SMEM scalar path).
    alpha = alpha_ref[0, 0]
    z = jnp.where(z >= 0, z, alpha * z)

    # Linear + eval-mode BatchNorm, pre-folded into W' and b' in the wrapper:
    #   out = z @ (W^T * bn_scale) + (b * bn_scale + bn_shift)
    y = jnp.dot(z, w_ref[...], preferred_element_type=jnp.float32)
    out_ref[...] = (y + bias_ref[0, :]).astype(out_ref.dtype)


def style_merge(style, cfc, alpha, W, b, gamma, beta, running_mean, running_var,
                eps=1e-5):
    """style: (B, C, 2); cfc: (C, 2); W: (outC, C); b/gamma/beta/stats: (outC,)."""
    B, C, two = style.shape
    assert two == 2
    outC = W.shape[0]

    # ---- Wrapper-side layout plumbing + constant folding (plain JAX glue). ----
    style_t = jnp.transpose(style, (2, 0, 1))              # (2, B, C)  C lane-dense
    cfc_t = jnp.transpose(cfc, (1, 0)).reshape(2, 1, C)    # (2, 1, C)

    inv_std = 1.0 / jnp.sqrt(running_var + eps)
    bn_scale = gamma * inv_std                             # (outC,)
    bn_shift = beta - running_mean * bn_scale              # (outC,)
    w_folded = jnp.transpose(W, (1, 0)) * bn_scale[None, :]      # (C, outC)
    b_folded = (b * bn_scale + bn_shift).reshape(1, outC)        # (1, outC)

    alpha_arr = jnp.full((1, 1), alpha, dtype=jnp.float32)

    return pl.pallas_call(
        style_merge_kernel,
        out_shape=jax.ShapeDtypeStruct((B, outC), style.dtype),
        grid=(1,),
        in_specs=[
            # PReLU alpha: scalar, keep it on the scalar path (SMEM).
            pl.BlockSpec(memory_space=pltpu.MemorySpace.SMEM),
            pl.BlockSpec((2, B, C), lambda i: (0, 0, 0)),        # style
            pl.BlockSpec((2, 1, C), lambda i: (0, 0, 0)),        # cfc
            pl.BlockSpec((C, outC), lambda i: (0, 0)),           # W^T with BN scale folded
            pl.BlockSpec((1, outC), lambda i: (0, 0)),           # fused bias (linear + BN)
        ],
        out_specs=pl.BlockSpec((B, outC), lambda i: (0, 0)),
    )(alpha_arr, style_t, cfc_t, w_folded, b_folded)


if __name__ == "__main__":
    B, C, outC = 8, 64, 512

    key = jax.random.PRNGKey(0)
    k1, k2, k3, k4 = jax.random.split(key, 4)

    # Inputs / parameters (deterministic, in-script).
    # Note: PyTorch __init__ fills cfc with 0 (degenerate output); we use small
    # deterministic random values instead to exercise the full path.
    style = jax.random.normal(k1, (B, C, 2), dtype=jnp.float32)
    cfc = jax.random.normal(k2, (C, 2), dtype=jnp.float32) * 0.1
    alpha = jnp.float32(0.25)                                # PReLU default init
    W = jax.random.normal(k3, (outC, C), dtype=jnp.float32) / jnp.sqrt(C)
    b = jax.random.normal(k4, (outC,), dtype=jnp.float32) * 0.01
    gamma = jnp.ones((outC,), dtype=jnp.float32)             # BN weight
    beta = jnp.zeros((outC,), dtype=jnp.float32)             # BN bias
    rmean = jnp.zeros((outC,), dtype=jnp.float32)
    rvar = jnp.ones((outC,), dtype=jnp.float32)
    eps = 1e-5

    out = style_merge(style, cfc, alpha, W, b, gamma, beta, rmean, rvar, eps=eps)
    out = jax.block_until_ready(out)

    # Pure-JAX reference of the PyTorch forward (eval-mode BN).
    z = jnp.sum(style * cfc[None, :, :], axis=2)
    z = jnp.where(z >= 0, z, alpha * z)
    z = z @ W.T + b
    ref = (z - rmean) / jnp.sqrt(rvar + eps) * gamma + beta

    assert out.shape == (B, outC)
    assert jnp.allclose(out, ref, atol=1e-4, rtol=1e-4), "mismatch vs reference"
    print("KERNEL_OK")
</pallas_src>

<mosaic_0001>
module attributes {stable_mosaic.version = 11 : i64} {
  func.func @style_merge_kernel(%arg0: i32, %arg1: memref<1x1xf32, #tpu.memory_space<smem>>, %arg2: memref<2x8x64xf32, #tpu.memory_space<vmem>>, %arg3: memref<2x1x64xf32, #tpu.memory_space<vmem>>, %arg4: memref<64x512xf32, #tpu.memory_space<vmem>>, %arg5: memref<1x512xf32, #tpu.memory_space<vmem>>, %arg6: memref<8x512xf32, #tpu.memory_space<vmem>>) attributes {dimension_semantics = [#tpu.dimension_semantics<arbitrary>], iteration_bounds = array<i64: 1>, scalar_prefetch = 0 : i64, scratch_operands = 0 : i64, tpu.core_type = #tpu.core_type<tc>, window_params = [{transform_indices = @transform_0, window_bounds = array<i64: 1, 1>}, {pipeline_mode = #tpu.pipeline_mode<synchronous>, transform_indices = @transform_1, window_bounds = array<i64: 2, 8, 64>}, {pipeline_mode = #tpu.pipeline_mode<synchronous>, transform_indices = @transform_2, window_bounds = array<i64: 2, 1, 64>}, {pipeline_mode = #tpu.pipeline_mode<synchronous>, transform_indices = @transform_3, window_bounds = array<i64: 64, 512>}, {pipeline_mode = #tpu.pipeline_mode<synchronous>, transform_indices = @transform_4, window_bounds = array<i64: 1, 512>}, {pipeline_mode = #tpu.pipeline_mode<synchronous>, transform_indices = @transform_5, window_bounds = array<i64: 8, 512>}]} {
    %c0 = arith.constant 0 : index
    %c0_0 = arith.constant 0 : index
    %c0_1 = arith.constant 0 : index
    %0 = vector.load %arg2[%c0, %c0_0, %c0_1] : memref<2x8x64xf32, #tpu.memory_space<vmem>>, vector<1x8x64xf32>
    %1 = vector.shape_cast %0 : vector<1x8x64xf32> to vector<8x64xf32>
    %c0_2 = arith.constant 0 : index
    %c0_3 = arith.constant 0 : index
    %c0_4 = arith.constant 0 : index
    %2 = vector.load %arg3[%c0_2, %c0_3, %c0_4] : memref<2x1x64xf32, #tpu.memory_space<vmem>>, vector<1x1x64xf32>
    %3 = vector.shape_cast %2 : vector<1x1x64xf32> to vector<1x64xf32>
    %4 = vector.broadcast %3 : vector<1x64xf32> to vector<8x64xf32>
    %5 = arith.mulf %1, %4 : vector<8x64xf32>
    %c1 = arith.constant 1 : index
    %c0_5 = arith.constant 0 : index
    %c0_6 = arith.constant 0 : index
    %6 = vector.load %arg2[%c1, %c0_5, %c0_6] : memref<2x8x64xf32, #tpu.memory_space<vmem>>, vector<1x8x64xf32>
    %7 = vector.shape_cast %6 : vector<1x8x64xf32> to vector<8x64xf32>
    %c1_7 = arith.constant 1 : index
    %c0_8 = arith.constant 0 : index
    %c0_9 = arith.constant 0 : index
    %8 = vector.load %arg3[%c1_7, %c0_8, %c0_9] : memref<2x1x64xf32, #tpu.memory_space<vmem>>, vector<1x1x64xf32>
    %9 = vector.shape_cast %8 : vector<1x1x64xf32> to vector<1x64xf32>
    %10 = vector.broadcast %9 : vector<1x64xf32> to vector<8x64xf32>
    %11 = arith.mulf %7, %10 : vector<8x64xf32>
    %12 = arith.addf %5, %11 : vector<8x64xf32>
    %c0_10 = arith.constant 0 : index
    %c0_11 = arith.constant 0 : index
    %13 = memref.load %arg1[%c0_10, %c0_11] : memref<1x1xf32, #tpu.memory_space<smem>>
    %cst = arith.constant 0.000000e+00 : f32
    %14 = vector.broadcast %cst : f32 to vector<8x64xf32>
    %15 = arith.cmpf oge, %12, %14 : vector<8x64xf32>
    %16 = vector.broadcast %13 : f32 to vector<8x64xf32>
    %17 = arith.mulf %16, %12 : vector<8x64xf32>
    %18 = arith.select %15, %12, %17 : vector<8x64xi1>, vector<8x64xf32>
    %c0_12 = arith.constant 0 : index
    %c0_13 = arith.constant 0 : index
    %19 = vector.load %arg4[%c0_12, %c0_13] : memref<64x512xf32, #tpu.memory_space<vmem>>, vector<64x512xf32>
    %cst_14 = arith.constant dense<0.000000e+00> : vector<8x512xf32>
    %20 = tpu.matmul %18, %19, %cst_14 {dimension_numbers = #tpu.dot_dimension_numbers<[1], [0], [0], [1], [0, 0, 1, 1], [], []>} : vector<8x64xf32>, vector<64x512xf32>, vector<8x512xf32> -> vector<8x512xf32>
    %c0_15 = arith.constant 0 : index
    %c0_16 = arith.constant 0 : index
    %21 = vector.load %arg5[%c0_15, %c0_16] : memref<1x512xf32, #tpu.memory_space<vmem>>, vector<1x512xf32>
    %22 = vector.shape_cast %21 : vector<1x512xf32> to vector<512xf32>
    %23 = vector.shape_cast %22 : vector<512xf32> to vector<1x512xf32>
    %24 = vector.broadcast %23 : vector<1x512xf32> to vector<8x512xf32>
    %25 = arith.addf %20, %24 : vector<8x512xf32>
    %c0_17 = arith.constant 0 : index
    %c0_18 = arith.constant 0 : index
    %26 = vector.load %arg6[%c0_17, %c0_18] : memref<8x512xf32, #tpu.memory_space<vmem>>, vector<8x512xf32>
    tpu.vector_store %arg6[%c0_17, %c0_18], %25 {strides = array<i32>} : memref<8x512xf32, #tpu.memory_space<vmem>>, vector<8x512xf32>,
    return
  }
  func.func @transform_0(%arg0: i32) -> (i32, i32) {
    %c0_i32 = arith.constant 0 : i32
    %c0_i32_0 = arith.constant 0 : i32
    %c0_i32_1 = arith.constant 0 : i32
    return %c0_i32, %c0_i32_0 : i32, i32
  }
  func.func @transform_1(%arg0: i32) -> (i32, i32, i32) {
    %c0_i32 = arith.constant 0 : i32
    %c0_i32_0 = arith.constant 0 : i32
    %c0_i32_1 = arith.constant 0 : i32
    %c0_i32_2 = arith.constant 0 : i32
    return %c0_i32, %c0_i32_0, %c0_i32_1 : i32, i32, i32
  }
  func.func @transform_2(%arg0: i32) -> (i32, i32, i32) {
    %c0_i32 = arith.constant 0 : i32
    %c0_i32_0 = arith.constant 0 : i32
    %c0_i32_1 = arith.constant 0 : i32
    %c0_i32_2 = arith.constant 0 : i32
    return %c0_i32, %c0_i32_0, %c0_i32_1 : i32, i32, i32
  }
  func.func @transform_3(%arg0: i32) -> (i32, i32) {
    %c0_i32 = arith.constant 0 : i32
    %c0_i32_0 = arith.constant 0 : i32
    %c0_i32_1 = arith.constant 0 : i32
    return %c0_i32, %c0_i32_0 : i32, i32
  }
  func.func @transform_4(%arg0: i32) -> (i32, i32) {
    %c0_i32 = arith.constant 0 : i32
    %c0_i32_0 = arith.constant 0 : i32
    %c0_i32_1 = arith.constant 0 : i32
    return %c0_i32, %c0_i32_0 : i32, i32
  }
  func.func @transform_5(%arg0: i32) -> (i32, i32) {
    %c0_i32 = arith.constant 0 : i32
    %c0_i32_0 = arith.constant 0 : i32
    %c0_i32_1 = arith.constant 0 : i32
    return %c0_i32, %c0_i32_0 : i32, i32
  }
}

</mosaic_0001>

<bundles_post_ra>
// kernel: tpu_custom_call.1
= control target key start
LH: loop header
LB: loop body
LE: loop exit
PB: predicated region body
PF: predicated region fallthrough
CT: control target
= control target key end

     0   :  { %11 = vsyncpa [#allocation4], 0  ;;  %s499_s0 = inlined_call_operand.<no memory space> [shape: f32[1,1], index: 0, kind: input, shape index: {}]   ;;  %s500_s1 = inlined_call_operand.hbm [shape: f32[2,8,64], index: 1, kind: input, shape index: {}]   ;;  %s501_s2 = inlined_call_operand.vmem [shape: f32[2,1,64], index: 2, kind: input, shape index: {}]   ;;  %s502_s3 = inlined_call_operand.hbm [shape: f32[64,512], index: 3, kind: input, shape index: {}]   ;;  %s503_s4 = inlined_call_operand.vmem [shape: f32[1,512], index: 4, kind: input, shape index: {}]   ;;  %s504_s5 = inlined_call_operand.hbm [shape: f32[8,512], index: 5, kind: output, shape index: {}]  }
   0x1   :  { %12 = vsyncpa [#allocation7], 0 }
   0x2   :  { %13 = vsyncpa [#allocation5], 0  ;;  %s413_s18 = smov [#allocation3]   ;;  %s341_s22 = scalar_lea.hbm %s500_s1, 256 }
   0x3   :  { %s21_s19 = sshll.u32 %s413_s18, 4  ;;  %p342_p0 = scmp.ne.s32.totalorder %s500_s1, %s341_s22  ;;  %s22_s19 = int_to_ptr.vmem [resolvable:$true] %s21_s19 }
   0x4   :  { %p345_p1 = scmp.lt.u32.totalorder %s341_s22, %s500_s1 }
   0x6   :  { %p347_p2 = pnand %p345_p1, %p342_p0 }
   0x8   :  { %350 = shalt.err (!%p347_p2)
}
   0x9   :  { %s351_s27 = scalar_lea.vmem %s22_s19, 256  ;;  %p356_p4 = scmp.lt.s32.totalorder %s22_s19, %s22_s19 }
   0xa   :  { %p352_p3 = scmp.ne.s32.totalorder %s22_s19, %s351_s27  ;;  %p357_p5 = scmp.lt.s32.totalorder %s351_s27, %s351_s27 }
   0xc   :  { %p358_p6 = por %p357_p5, %p356_p4 }
   0xe   :  { %p359_p7 = pnand %p358_p6, %p352_p3 }
  0x10   :  { %362 = shalt.err (!%p359_p7)
}
  0x11   :  { %s414_s28 = smov 128   ;;  %s415_s29 = smov 8  }
  0x12   :  { %27 = dma.hbm_to_vmem [thread:$0]  %s500_s1, 256, %s22_s19, [#allocation4], %s414_s28, %s414_s28, %s415_s29  }
  0x13   :  { %s416_s7 = smov [#allocation6]   ;;  %s363_s11 = scalar_lea.hbm %s502_s3, 4096 }
  0x14   :  { %s35_s8 = sshll.u32 %s416_s7, 4  ;;  %p364_p8 = scmp.ne.s32.totalorder %s502_s3, %s363_s11  ;;  %s36_s8 = int_to_ptr.vmem [resolvable:$true] %s35_s8 }
  0x15   :  { %p367_p9 = scmp.lt.u32.totalorder %s363_s11, %s502_s3 }
  0x17   :  { %p369_p10 = pnand %p367_p9, %p364_p8 }
  0x19   :  { %372 = shalt.err (!%p369_p10)
}
  0x1a   :  { %s373_s16 = scalar_lea.vmem %s36_s8, 4096  ;;  %p378_p12 = scmp.lt.s32.totalorder %s36_s8, %s36_s8 }
  0x1b   :  { %p374_p11 = scmp.ne.s32.totalorder %s36_s8, %s373_s16  ;;  %p379_p13 = scmp.lt.s32.totalorder %s373_s16, %s373_s16 }
  0x1d   :  { %p380_p0 = por %p379_p13, %p378_p12 }
  0x1f   :  { %p381_p1 = pnand %p380_p0, %p374_p11 }
  0x21   :  { %384 = shalt.err (!%p381_p1)
}
  0x22   :  { %s417_s1 = smov 512   ;;  %s418_s17 = smov 32  }
  0x23   :  { %41 = dma.hbm_to_vmem [thread:$0]  %s502_s3, 4096, %s36_s8, [#allocation7], %s417_s1, %s417_s1, %s418_s17  }
  0x24   :  { %407 = dma.done.wait [#allocation4], 256  }
  0x25   :  { %408 = vsyncadd [#allocation4], 4294967040 }
  0x26   :  { %409 = dma.done.wait [#allocation7], 4096  }
  0x27   :  { %410 = vsyncadd [#allocation7], 4294963200  ;;  %v419_v0 = vmov 0.0   ;;  %v77_v1 = vld [vmem:[#allocation6 + $0x8] sm:$0xff]  ;;  %v79_v3 = vld [vmem:[#allocation6 + $0x18] sm:$0xff]  ;;  %v73_v55 = vstv %s499_s0  ;;  %vm130_vm1 = vcmask 523264   ;;  %v110_v59 = vlaneseq }
  0x28   :  { %198 = vmatprep.mubr.f32.mxu0 %v419_v0  ;;  %269 = vmatprep.mubr.f32.mxu1 %v419_v0  ;;  %v81_v2 = vld [vmem:[#allocation6 + $0x28] sm:$0xff]  ;;  %v83_v5 = vld [vmem:[#allocation6 + $0x38] sm:$0xff]  ;;  %v76_v6 = vld [vmem:[#allocation6] sm:$0xff]  ;;  %s420_s0 = smov [#allocation8]  }
  0x29   :  { %v301_v4 = vpack.c.bf16 %v81_v2, %v77_v1  ;;  %v80_v7 = vld [vmem:[#allocation6 + $0x20] sm:$0xff]  ;;  %v317_v8 = vpack.c.bf16 %v83_v5, %v79_v3  ;;  %v78_v10 = vld [vmem:[#allocation6 + $0x10] sm:$0xff]  ;;  %v85_v12 = vld [vmem:[#allocation6 + $0x48] sm:$0xff]  ;;  %v111_v60 = vshrl.u32 %v110_v59, 7  ;;  %s286_s26 = sshll.u32 %s420_s0, 4  ;;  %s287_s26 = int_to_ptr.vmem [resolvable:$true] %s286_s26 }
  0x2a   :  { %v303_v9 = vpack.c.bf16 %v80_v7, %v76_v6  ;;  %v82_v11 = vld [vmem:[#allocation6 + $0x30] sm:$0xff]  ;;  %v89_v14 = vld [vmem:[#allocation6 + $0x68] sm:$0xff]  ;;  %v87_v15 = vld [vmem:[#allocation6 + $0x58] sm:$0xff]  ;;  %p390_p3 = scmp.lt.s32.totalorder %s287_s26, %s287_s26 }
  0x2b   :  { %302 = vmatprep.subr.bf16.mxu0 %v301_v4  ;;  %v319_v13 = vpack.c.bf16 %v82_v11, %v78_v10  ;;  %v91_v16 = vld [vmem:[#allocation6 + $0x78] sm:$0xff]  ;;  %318 = vmatprep.subr.bf16.mxu1 %v317_v8  ;;  %v305_v17 = vpack.c.bf16 %v89_v14, %v85_v12  ;;  %v84_v19 = vld [vmem:[#allocation6 + $0x40] sm:$0xff]  ;;  %v86_v21 = vld [vmem:[#allocation6 + $0x50] sm:$0xff]  ;;  %v112_v61 = vsub.s32 0, %v111_v60  ;;  %v120_v63 = vsub.s32 2, %v111_v60 }
  0x2c   :  { %304 = vmatpush1.bf16.msra.mxu0 %v303_v9  ;;  %v321_v18 = vpack.c.bf16 %v91_v16, %v87_v15  ;;  %v88_v20 = vld [vmem:[#allocation6 + $0x60] sm:$0xff]  ;;  %v90_v23 = vld [vmem:[#allocation6 + $0x70] sm:$0xff]  ;;  %v93_v24 = vld [vmem:[#allocation6 + $0x88] sm:$0xff]  ;;  %v116_v0 = vsub.s32 1, %v111_v60  ;;  %v124_v1 = vsub.s32 3, %v111_v60 }
  0x2d   :  { %320 = vmatpush1.bf16.msra.mxu1 %v319_v13  ;;  %v307_v22 = vpack.c.bf16 %v88_v20, %v84_v19  ;;  %v97_v25 = vld [vmem:[#allocation6 + $0xa8] sm:$0xff]  ;;  %306 = vmatprep.subr.bf16.mxu0 %v305_v17  ;;  %v323_v26 = vpack.c.bf16 %v90_v23, %v86_v21  ;;  %v95_v28 = vld [vmem:[#allocation6 + $0x98] sm:$0xff]  ;;  %v92_v30 = vld [vmem:[#allocation6 + $0x80] sm:$0xff] }
  0x2e   :  { %322 = vmatprep.subr.bf16.mxu1 %v321_v18  ;;  %v309_v27 = vpack.c.bf16 %v97_v25, %v93_v24  ;;  %v99_v29 = vld [vmem:[#allocation6 + $0xb8] sm:$0xff]  ;;  %v96_v32 = vld [vmem:[#allocation6 + $0xa0] sm:$0xff]  ;;  %v94_v33 = vld [vmem:[#allocation6 + $0x90] sm:$0xff] }
  0x2f   :  { %v325_v31 = vpack.c.bf16 %v99_v29, %v95_v28  ;;  %v98_v34 = vld [vmem:[#allocation6 + $0xb0] sm:$0xff]  ;;  %v311_v35 = vpack.c.bf16 %v96_v32, %v92_v30  ;;  %v101_v36 = vld [vmem:[#allocation6 + $0xc8] sm:$0xff]  ;;  %v103_v38 = vld [vmem:[#allocation6 + $0xd8] sm:$0xff] }
  0x30   :  { %308 = vmatpush1.bf16.msra.mxu0 %v307_v22  ;;  %v105_v37 = vld [vmem:[#allocation6 + $0xe8] sm:$0xff]  ;;  %v327_v39 = vpack.c.bf16 %v98_v34, %v94_v33  ;;  %v107_v41 = vld [vmem:[#allocation6 + $0xf8] sm:$0xff]  ;;  %v100_v42 = vld [vmem:[#allocation6 + $0xc0] sm:$0xff] }
  0x31   :  { %324 = vmatpush1.bf16.msra.mxu1 %v323_v26  ;;  %310 = vmatprep.subr.bf16.mxu0 %v309_v27  ;;  %v313_v40 = vpack.c.bf16 %v105_v37, %v101_v36  ;;  %v104_v43 = vld [vmem:[#allocation6 + $0xe0] sm:$0xff]  ;;  %v329_v44 = vpack.c.bf16 %v107_v41, %v103_v38  ;;  %v102_v45 = vld [vmem:[#allocation6 + $0xd0] sm:$0xff]  ;;  %v60_v49 = vld [vmem:[#allocation3 + $0x8] sm:$0xff] }
  0x32   :  { %326 = vmatprep.subr.bf16.mxu1 %v325_v31  ;;  %v106_v46 = vld [vmem:[#allocation6 + $0xf0] sm:$0xff]  ;;  %v315_v51 = vpack.c.bf16 %v104_v43, %v100_v42 }
  0x33   :  { %v50_v47 = vld [vmem:[#allocation3] sm:$0xff]  ;;  %v331_v54 = vpack.c.bf16 %v106_v46, %v102_v45 }
  0x34   :  { %v296_v48 = vld [vmem:[%s501_s2] ss:$0 sm:$0xff]  ;;  %v298_v50 = vld [vmem:[%s501_s2 + $0x1] ss:$0 sm:$0xff]  ;;  %312 = vmatpush1.bf16.msra.mxu0 %v311_v35 }
  0x35   :  { %v58_v52 = vmul.f32 %v296_v48, %v50_v47  ;;  %v69_v53 = vmul.f32 %v298_v50, %v60_v49  ;;  %328 = vmatpush1.bf16.msra.mxu1 %v327_v39  ;;  %314 = vmatprep.subr.bf16.mxu0 %v313_v40  ;;  %v108_v62 = vld [vmem:[%s503_s4] sm:$0xf]  ;;  %s385_s4 = scalar_lea.vmem %s287_s26, 512 }
  0x36   :  { %330 = vmatprep.subr.bf16.mxu1 %v329_v44  ;;  %v113_v2 = vrot.slane %v108_v62, %v112_v61  ;;  %v121_v3 = vrot.slane %v108_v62, %v120_v63  ;;  %v117_v4 = vrot.slane %v108_v62, %v116_v0  ;;  %v125_v5 = vrot.slane %v108_v62, %v124_v1  ;;  %p386_p2 = scmp.ne.s32.totalorder %s287_s26, %s385_s4  ;;  %p391_p4 = scmp.lt.s32.totalorder %s385_s4, %s385_s4 }
  0x37   :  { %v70_v56 = vadd.f32 %v69_v53, %v58_v52 }
  0x38   :  { %316 = vmatpush1.bf16.msra.mxu0 %v315_v51  ;;  %p392_p5 = por %p391_p4, %p390_p3 }
  0x39   :  { %vm72_vm0 = vcmp.ge.f32.partialorder %v70_v56, 0.0  ;;  %v74_v57 = vmul.f32 %v73_v55, %v70_v56  ;;  %332 = vmatpush1.bf16.msra.mxu1 %v331_v54 }
  0x3a   :  { %p393_p6 = pnand %p392_p5, %p386_p2 }
  0x3b   :  { %v75_v58 = vsel %vm72_vm0, %v70_v56, %v74_v57 }
  0x3c   :  { %299 = vmatmul.mubr.msk.f32.vlgmr.msra.gmra.mrb[0].mxu0 %vm130_vm1, %v75_v58  ;;  %300 = vmatmul.mubr.msk.f32.vlgmr.msra.gmra.mrb[0].mxu1 %vm130_vm1, %v75_v58 }
 0x10f   :  { %v200_v6 = vpop.f32.mrb[0].mxu0  ;;  %v271_v8 = vpop.f32.mrb[0].mxu1 }
 0x110   :  { %v201_v7 = vadd.f32 %v200_v6, %v113_v2  ;;  %v202_v9 = vpop.f32.mrb[1].mxu0  ;;  %v272_v10 = vadd.f32 %v271_v8, %v121_v3  ;;  %v273_v12 = vpop.f32.mrb[1].mxu1 }
 0x111   :  { %v203_v11 = vadd.f32 %v202_v9, %v117_v4  ;;  %v274_v13 = vadd.f32 %v273_v12, %v125_v5 }
 0x112   :  { %276 = vst [vmem:[#allocation8] sm:$0xff] %v201_v7  ;;  %278 = vst [vmem:[#allocation8 + $0x10] sm:$0xff] %v272_v10 }
 0x113   :  { %277 = vst [vmem:[#allocation8 + $0x8] sm:$0xff] %v203_v11  ;;  %279 = vst [vmem:[#allocation8 + $0x18] sm:$0xff] %v274_v13 }
 0x114   :  { %396 = shalt.err (!%p393_p6)
}
 0x115   :  { %s397_s29 = scalar_lea.hbm %s504_s5, 512 }
 0x116   :  { %p398_p7 = scmp.ne.s32.totalorder %s504_s5, %s397_s29  ;;  %p401_p8 = scmp.lt.u32.totalorder %s397_s29, %s504_s5 }
 0x118   :  { %p403_p9 = pnand %p401_p8, %p398_p7 }
 0x11a   :  { %406 = shalt.err (!%p403_p9)
}
 0x11b   :  { %289 = dma.vmem_to_hbm [thread:$0]  %s287_s26, 512, %s504_s5, [#allocation5]  }
 0x11c   :  { %411 = dma.done.wait [#allocation5], 512  }
 0x11d   :  { %412 = vsyncadd [#allocation5], 4294966784 }
 0x11e   :  { %293 = vsyncpa [#allocation4], 1 }
 0x11f   :  { %294 = vsyncpa [#allocation7], 1 }
 0x120   :  { %295 = vsyncpa [#allocation5], 1 }

</bundles_post_ra>
